<compile_context>
chip_gen: v6e
topology: v6e:2x2x1
jax: 0.10.0
libtpu: 0.0.40
codegen_flags: <defaults>
</compile_context>

<pallas_src>
import functools

import jax
import jax.numpy as jnp
from jax.experimental import pallas as pl
from jax.experimental.pallas import tpu as pltpu


def _depthwise_conv_tile(x_f32, w_ref, mask_ref, pad_scr, *, H, W, K, P):
    """K*K depthwise conv on a (Bt, H*W) row-major flattened tile (f32).

    pad_scr is a (Bt, H*W + 2P) VMEM scratch used as a zero halo so the
    out-of-image taps in the H direction read zeros; mask_ref[kw] zeroes the
    taps that wrap around in the W direction of the flattened layout.
    """
    HW = H * W
    pad = K // 2

    # Zero-filled lane halo: scratch[:, P + q] = x[:, q] for q in [0, HW), else 0.
    pad_scr[...] = jnp.zeros(pad_scr.shape, pad_scr.dtype)
    pad_scr[:, P:P + HW] = x_f32
    padded = pad_scr[...]                                     # (Bt, HW + 2P)

    acc = jnp.zeros_like(x_f32)
    for kh in range(K):
        for kw in range(K):
            s = (kh - pad) * W + (kw - pad)
            tap = padded[:, P + s:P + s + HW]                 # == x[h+dh, w+dw] (flat)
            if kw != pad:                                     # kill width wrap-around
                tap = tap * mask_ref[kw:kw + 1, :]
            # per-row (= per image, channel) tap weight, broadcast over lanes
            acc = acc + tap * w_ref[:, kh * K + kw:kh * K + kw + 1]
    return acc


def _conv_stats_kernel(x_ref, w_ref, mask_ref, sum_ref, sq_ref, pad_scr, *, H, W, K, P):
    """Pass 1: per-row conv sum and sum-of-squares (tiny outputs, no conv writeback)."""
    x = x_ref[...].astype(jnp.float32)
    conv = _depthwise_conv_tile(x, w_ref, mask_ref, pad_scr, H=H, W=W, K=K, P=P)
    sum_ref[...] = jnp.sum(conv, axis=1, keepdims=True)
    sq_ref[...] = jnp.sum(conv * conv, axis=1, keepdims=True)


def _conv_bn_max_kernel(x_ref, w_ref, mask_ref, shift_ref, o_ref, pad_scr, *, H, W, K, P):
    """Pass 2: fused conv-recompute (BN scale pre-folded into weights) + shift + max."""
    x = x_ref[...].astype(jnp.float32)
    conv = _depthwise_conv_tile(x, w_ref, mask_ref, pad_scr, H=H, W=W, K=K, P=P)
    bn = conv + shift_ref[...]                 # scale already folded into the weights
    o_ref[...] = jnp.maximum(x, bn).astype(o_ref.dtype)


def _pick_row_tile(rows, hw, itemsize=4, target_bytes=2 * 1024 * 1024, min_steps=4):
    """Largest multiple-of-8 divisor of `rows` whose f32 block fits the VMEM budget,
    preferring tiles that still leave >= min_steps grid steps for pipelining."""
    cands = [d for d in range(8, rows + 1, 8) if rows % d == 0]
    if not cands:
        return rows                               # rows < 8: full-dim block is allowed
    fitting = [d for d in cands if d * hw * itemsize <= target_bytes] or [min(cands)]
    pipelined = [d for d in fitting if rows // d >= min_steps]
    return max(pipelined) if pipelined else max(fitting)


def frelu_forward(x_nchw, weight, bias, gamma, beta, eps=1e-5):
    """FReLU forward.

    x_nchw : (N, C, H, W)   PyTorch layout (only free reshapes are applied)
    weight : (C, 1, K, K)   depthwise conv weight (groups = C)
    bias, gamma, beta : (C,)
    """
    N, C, H, W = x_nchw.shape
    K = weight.shape[-1]
    pad = K // 2
    R, HW = N * C, H * W

    # Free (contiguous) reshape to a lane-dense 2D view: rows = (n, c), cols = h*W + w.
    x2d = x_nchw.reshape(R, HW)

    # Per-row conv weights (row r = n*C + c  ->  channel c), flattened taps on lanes.
    w_rows = jnp.tile(weight.reshape(C, K * K).astype(jnp.float32), (N, 1))     # (R, K*K)

    # Column masks killing the width wrap-around of the flattened taps.
    w_idx = jnp.arange(HW, dtype=jnp.int32) % W
    col_masks = jnp.stack(
        [((w_idx + (kw - pad) >= 0) & (w_idx + (kw - pad) <= W - 1)).astype(jnp.float32)
         for kw in range(K)])                                                    # (K, HW)

    Bt = _pick_row_tile(R, HW)
    grid = (R // Bt,)
    P = ((pad * (W + 1) + 127) // 128) * 128         # lane-aligned halo width
    scratch = pltpu.VMEM((Bt, HW + 2 * P), jnp.float32)

    # ---------- pass 1: per-row conv sum / sum-of-squares ----------
    sums, sqs = pl.pallas_call(
        functools.partial(_conv_stats_kernel, H=H, W=W, K=K, P=P),
        grid=grid,
        in_specs=[
            pl.BlockSpec((Bt, HW), lambda r: (r, 0)),
            pl.BlockSpec((Bt, K * K), lambda r: (r, 0)),
            pl.BlockSpec((K, HW), lambda r: (0, 0)),
        ],
        out_specs=[
            pl.BlockSpec((Bt, 1), lambda r: (r, 0)),
            pl.BlockSpec((Bt, 1), lambda r: (r, 0)),
        ],
        out_shape=[
            jax.ShapeDtypeStruct((R, 1), jnp.float32),
            jax.ShapeDtypeStruct((R, 1), jnp.float32),
        ],
        scratch_shapes=[scratch],
        compiler_params=pltpu.CompilerParams(dimension_semantics=("parallel",)),
    )(x2d, w_rows, col_masks)

    # ---------- finish BN statistics (tiny (N, C) combine on host side) ----------
    count = N * H * W
    mean = jnp.sum(sums.reshape(N, C), axis=0) / count
    # NOTE: E[y^2] - E[y]^2 in f32; a Welford-style combine would be more robust
    # for very large spatial sizes with a large conv mean.
    var = jnp.maximum(jnp.sum(sqs.reshape(N, C), axis=0) / count - mean * mean, 0.0)
    scale = gamma.astype(jnp.float32) / jnp.sqrt(var + eps)
    shift = beta.astype(jnp.float32) - mean * scale
    # The depthwise-conv bias is a per-channel constant: training-mode BN subtracts
    # the batch mean, so the bias cancels exactly and is dropped from the compute.
    del bias

    # Fold the BN scale into the conv weights for the fused second pass.
    w_scaled_rows = w_rows * jnp.tile(scale.reshape(C, 1), (N, 1))               # (R, K*K)
    shift_rows = jnp.tile(shift.reshape(C, 1), (N, 1))                           # (R, 1)

    # ---------- pass 2: fused conv-recompute + BN + max, lane-dense output ----------
    out2d = pl.pallas_call(
        functools.partial(_conv_bn_max_kernel, H=H, W=W, K=K, P=P),
        grid=grid,
        in_specs=[
            pl.BlockSpec((Bt, HW), lambda r: (r, 0)),
            pl.BlockSpec((Bt, K * K), lambda r: (r, 0)),
            pl.BlockSpec((K, HW), lambda r: (0, 0)),
            pl.BlockSpec((Bt, 1), lambda r: (r, 0)),
        ],
        out_specs=pl.BlockSpec((Bt, HW), lambda r: (r, 0)),
        out_shape=jax.ShapeDtypeStruct((R, HW), x_nchw.dtype),
        scratch_shapes=[scratch],
        compiler_params=pltpu.CompilerParams(dimension_semantics=("parallel",)),
    )(x2d, w_scaled_rows, col_masks, shift_rows)

    return out2d.reshape(N, C, H, W)


def _frelu_reference(x, weight, bias, gamma, beta, eps=1e-5):
    """Pure-JAX reference of the PyTorch module forward (training-mode BN)."""
    N, C, H, W = x.shape
    conv = jax.lax.conv_general_dilated(
        x.astype(jnp.float32), weight.astype(jnp.float32),
        window_strides=(1, 1), padding="SAME",
        dimension_numbers=("NCHW", "OIHW", "NCHW"),
        feature_group_count=C,
        precision=jax.lax.Precision.HIGHEST)
    conv = conv + bias.reshape(1, C, 1, 1)
    mean = jnp.mean(conv, axis=(0, 2, 3), keepdims=True)
    var = jnp.var(conv, axis=(0, 2, 3), keepdims=True)
    bn = (conv - mean) * (gamma.reshape(1, C, 1, 1) / jnp.sqrt(var + eps)) \
        + beta.reshape(1, C, 1, 1)
    return jnp.maximum(x.astype(jnp.float32), bn).astype(x.dtype)


if __name__ == "__main__":
    N, C, H, W, K = 2, 4, 16, 16, 3

    key = jax.random.PRNGKey(0)
    kx, kw, kb, kg, kbeta = jax.random.split(key, 5)

    x = jax.random.normal(kx, (N, C, H, W), dtype=jnp.float32)
    # Deterministic "module" parameters (Conv2d depthwise weight/bias, BN gamma/beta).
    weight = jax.random.normal(kw, (C, 1, K, K), dtype=jnp.float32) * 0.3
    bias = jax.random.normal(kb, (C,), dtype=jnp.float32) * 0.1
    gamma = 1.0 + 0.1 * jax.random.normal(kg, (C,), dtype=jnp.float32)
    beta = 0.1 * jax.random.normal(kbeta, (C,), dtype=jnp.float32)

    y = jax.block_until_ready(frelu_forward(x, weight, bias, gamma, beta))
    assert y.shape == (N, C, H, W), y.shape

    # Numerical cross-check against the pure-JAX reference of the module.
    y_ref = jax.block_until_ready(_frelu_reference(x, weight, bias, gamma, beta))
    max_err = float(jnp.max(jnp.abs(y - y_ref)))
    assert max_err < 5e-4, f"max abs error vs reference: {max_err}"

    print("KERNEL_OK")
</pallas_src>

<mosaic_0001>
module attributes {stable_mosaic.version = 11 : i64} {
  func.func @_conv_stats_kernel(%arg0: i32, %arg1: memref<8x256xf32, #tpu.memory_space<vmem>>, %arg2: memref<8x9xf32, #tpu.memory_space<vmem>>, %arg3: memref<3x256xf32, #tpu.memory_space<vmem>>, %arg4: memref<8x1xf32, #tpu.memory_space<vmem>>, %arg5: memref<8x1xf32, #tpu.memory_space<vmem>>, %arg6: memref<8x512xf32, #tpu.memory_space<vmem>>) attributes {dimension_semantics = [#tpu.dimension_semantics<parallel>], iteration_bounds = array<i64: 1>, scalar_prefetch = 0 : i64, scratch_operands = 1 : i64, tpu.core_type = #tpu.core_type<tc>, window_params = [{transform_indices = @transform_0, window_bounds = array<i64: 8, 256>}, {transform_indices = @transform_1, window_bounds = array<i64: 8, 9>}, {pipeline_mode = #tpu.pipeline_mode<synchronous>, transform_indices = @transform_2, window_bounds = array<i64: 3, 256>}, {transform_indices = @transform_3, window_bounds = array<i64: 8, 1>}, {transform_indices = @transform_4, window_bounds = array<i64: 8, 1>}]} {
    %c0 = arith.constant 0 : index
    %c0_0 = arith.constant 0 : index
    %0 = vector.load %arg1[%c0, %c0_0] : memref<8x256xf32, #tpu.memory_space<vmem>>, vector<8x256xf32>
    %cst = arith.constant 0.000000e+00 : f32
    %1 = vector.broadcast %cst : f32 to vector<8x512xf32>
    %c0_1 = arith.constant 0 : index
    %c0_2 = arith.constant 0 : index
    %2 = vector.load %arg6[%c0_1, %c0_2] : memref<8x512xf32, #tpu.memory_space<vmem>>, vector<8x512xf32>
    tpu.vector_store %arg6[%c0_1, %c0_2], %1 {strides = array<i32>} : memref<8x512xf32, #tpu.memory_space<vmem>>, vector<8x512xf32>,
    %c0_3 = arith.constant 0 : index
    %c128 = arith.constant 128 : index
    %3 = vector.load %arg6[%c0_3, %c128] : memref<8x512xf32, #tpu.memory_space<vmem>>, vector<8x256xf32>
    tpu.vector_store %arg6[%c0_3, %c128], %0 {strides = array<i32>} : memref<8x512xf32, #tpu.memory_space<vmem>>, vector<8x256xf32>,
    %c0_4 = arith.constant 0 : index
    %c0_5 = arith.constant 0 : index
    %4 = vector.load %arg6[%c0_4, %c0_5] : memref<8x512xf32, #tpu.memory_space<vmem>>, vector<8x512xf32>
    %cst_6 = arith.constant 0.000000e+00 : f32
    %5 = vector.broadcast %cst_6 : f32 to vector<8x256xf32>
    %6 = vector.extract_strided_slice %4 {offsets = [0, 111], sizes = [8, 256], strides = [1, 1]} : vector<8x512xf32> to vector<8x256xf32>
    %c0_7 = arith.constant 0 : index
    %c0_8 = arith.constant 0 : index
    %7 = vector.load %arg3[%c0_7, %c0_8] : memref<3x256xf32, #tpu.memory_space<vmem>>, vector<1x256xf32>
    %8 = vector.broadcast %7 : vector<1x256xf32> to vector<8x256xf32>
    %9 = arith.mulf %6, %8 : vector<8x256xf32>
    %c0_9 = arith.constant 0 : index
    %c0_10 = arith.constant 0 : index
    %10 = vector.load %arg2[%c0_9, %c0_10] : memref<8x9xf32, #tpu.memory_space<vmem>>, vector<8x1xf32>
    %11 = vector.broadcast %10 : vector<8x1xf32> to vector<8x256xf32>
    %12 = arith.mulf %9, %11 : vector<8x256xf32>
    %13 = arith.addf %5, %12 : vector<8x256xf32>
    %14 = vector.extract_strided_slice %4 {offsets = [0, 112], sizes = [8, 256], strides = [1, 1]} : vector<8x512xf32> to vector<8x256xf32>
    %c0_11 = arith.constant 0 : index
    %c1 = arith.constant 1 : index
    %15 = vector.load %arg2[%c0_11, %c1] : memref<8x9xf32, #tpu.memory_space<vmem>>, vector<8x1xf32>
    %16 = vector.broadcast %15 : vector<8x1xf32> to vector<8x256xf32>
    %17 = arith.mulf %14, %16 : vector<8x256xf32>
    %18 = arith.addf %13, %17 : vector<8x256xf32>
    %19 = vector.extract_strided_slice %4 {offsets = [0, 113], sizes = [8, 256], strides = [1, 1]} : vector<8x512xf32> to vector<8x256xf32>
    %c2 = arith.constant 2 : index
    %c0_12 = arith.constant 0 : index
    %20 = vector.load %arg3[%c2, %c0_12] : memref<3x256xf32, #tpu.memory_space<vmem>>, vector<1x256xf32>
    %21 = vector.broadcast %20 : vector<1x256xf32> to vector<8x256xf32>
    %22 = arith.mulf %19, %21 : vector<8x256xf32>
    %c0_13 = arith.constant 0 : index
    %c2_14 = arith.constant 2 : index
    %23 = vector.load %arg2[%c0_13, %c2_14] : memref<8x9xf32, #tpu.memory_space<vmem>>, vector<8x1xf32>
    %24 = vector.broadcast %23 : vector<8x1xf32> to vector<8x256xf32>
    %25 = arith.mulf %22, %24 : vector<8x256xf32>
    %26 = arith.addf %18, %25 : vector<8x256xf32>
    %27 = vector.extract_strided_slice %4 {offsets = [0, 127], sizes = [8, 256], strides = [1, 1]} : vector<8x512xf32> to vector<8x256xf32>
    %c0_15 = arith.constant 0 : index
    %c0_16 = arith.constant 0 : index
    %28 = vector.load %arg3[%c0_15, %c0_16] : memref<3x256xf32, #tpu.memory_space<vmem>>, vector<1x256xf32>
    %29 = vector.broadcast %28 : vector<1x256xf32> to vector<8x256xf32>
    %30 = arith.mulf %27, %29 : vector<8x256xf32>
    %c0_17 = arith.constant 0 : index
    %c3 = arith.constant 3 : index
    %31 = vector.load %arg2[%c0_17, %c3] : memref<8x9xf32, #tpu.memory_space<vmem>>, vector<8x1xf32>
    %32 = vector.broadcast %31 : vector<8x1xf32> to vector<8x256xf32>
    %33 = arith.mulf %30, %32 : vector<8x256xf32>
    %34 = arith.addf %26, %33 : vector<8x256xf32>
    %35 = vector.extract_strided_slice %4 {offsets = [0, 128], sizes = [8, 256], strides = [1, 1]} : vector<8x512xf32> to vector<8x256xf32>
    %c0_18 = arith.constant 0 : index
    %c4 = arith.constant 4 : index
    %36 = vector.load %arg2[%c0_18, %c4] : memref<8x9xf32, #tpu.memory_space<vmem>>, vector<8x1xf32>
    %37 = vector.broadcast %36 : vector<8x1xf32> to vector<8x256xf32>
    %38 = arith.mulf %35, %37 : vector<8x256xf32>
    %39 = arith.addf %34, %38 : vector<8x256xf32>
    %40 = vector.extract_strided_slice %4 {offsets = [0, 129], sizes = [8, 256], strides = [1, 1]} : vector<8x512xf32> to vector<8x256xf32>
    %c2_19 = arith.constant 2 : index
    %c0_20 = arith.constant 0 : index
    %41 = vector.load %arg3[%c2_19, %c0_20] : memref<3x256xf32, #tpu.memory_space<vmem>>, vector<1x256xf32>
    %42 = vector.broadcast %41 : vector<1x256xf32> to vector<8x256xf32>
    %43 = arith.mulf %40, %42 : vector<8x256xf32>
    %c0_21 = arith.constant 0 : index
    %c5 = arith.constant 5 : index
    %44 = vector.load %arg2[%c0_21, %c5] : memref<8x9xf32, #tpu.memory_space<vmem>>, vector<8x1xf32>
    %45 = vector.broadcast %44 : vector<8x1xf32> to vector<8x256xf32>
    %46 = arith.mulf %43, %45 : vector<8x256xf32>
    %47 = arith.addf %39, %46 : vector<8x256xf32>
    %48 = vector.extract_strided_slice %4 {offsets = [0, 143], sizes = [8, 256], strides = [1, 1]} : vector<8x512xf32> to vector<8x256xf32>
    %c0_22 = arith.constant 0 : index
    %c0_23 = arith.constant 0 : index
    %49 = vector.load %arg3[%c0_22, %c0_23] : memref<3x256xf32, #tpu.memory_space<vmem>>, vector<1x256xf32>
    %50 = vector.broadcast %49 : vector<1x256xf32> to vector<8x256xf32>
    %51 = arith.mulf %48, %50 : vector<8x256xf32>
    %c0_24 = arith.constant 0 : index
    %c6 = arith.constant 6 : index
    %52 = vector.load %arg2[%c0_24, %c6] : memref<8x9xf32, #tpu.memory_space<vmem>>, vector<8x1xf32>
    %53 = vector.broadcast %52 : vector<8x1xf32> to vector<8x256xf32>
    %54 = arith.mulf %51, %53 : vector<8x256xf32>
    %55 = arith.addf %47, %54 : vector<8x256xf32>
    %56 = vector.extract_strided_slice %4 {offsets = [0, 144], sizes = [8, 256], strides = [1, 1]} : vector<8x512xf32> to vector<8x256xf32>
    %c0_25 = arith.constant 0 : index
    %c7 = arith.constant 7 : index
    %57 = vector.load %arg2[%c0_25, %c7] : memref<8x9xf32, #tpu.memory_space<vmem>>, vector<8x1xf32>
    %58 = vector.broadcast %57 : vector<8x1xf32> to vector<8x256xf32>
    %59 = arith.mulf %56, %58 : vector<8x256xf32>
    %60 = arith.addf %55, %59 : vector<8x256xf32>
    %61 = vector.extract_strided_slice %4 {offsets = [0, 145], sizes = [8, 256], strides = [1, 1]} : vector<8x512xf32> to vector<8x256xf32>
    %c2_26 = arith.constant 2 : index
    %c0_27 = arith.constant 0 : index
    %62 = vector.load %arg3[%c2_26, %c0_27] : memref<3x256xf32, #tpu.memory_space<vmem>>, vector<1x256xf32>
    %63 = vector.broadcast %62 : vector<1x256xf32> to vector<8x256xf32>
    %64 = arith.mulf %61, %63 : vector<8x256xf32>
    %c0_28 = arith.constant 0 : index
    %c8 = arith.constant 8 : index
    %65 = vector.load %arg2[%c0_28, %c8] : memref<8x9xf32, #tpu.memory_space<vmem>>, vector<8x1xf32>
    %66 = vector.broadcast %65 : vector<8x1xf32> to vector<8x256xf32>
    %67 = arith.mulf %64, %66 : vector<8x256xf32>
    %68 = arith.addf %60, %67 : vector<8x256xf32>
    %cst_29 = arith.constant dense<0.000000e+00> : vector<8xf32>
    %69 = vector.multi_reduction <add>, %68, %cst_29 [1] : vector<8x256xf32> to vector<8xf32>
    %70 = vector.shape_cast %69 : vector<8xf32> to vector<8x1xf32>
    %c0_30 = arith.constant 0 : index
    %c0_31 = arith.constant 0 : index
    %71 = vector.load %arg4[%c0_30, %c0_31] : memref<8x1xf32, #tpu.memory_space<vmem>>, vector<8x1xf32>
    tpu.vector_store %arg4[%c0_30, %c0_31], %70 {strides = array<i32>} : memref<8x1xf32, #tpu.memory_space<vmem>>, vector<8x1xf32>,
    %72 = arith.mulf %68, %68 : vector<8x256xf32>
    %cst_32 = arith.constant dense<0.000000e+00> : vector<8xf32>
    %73 = vector.multi_reduction <add>, %72, %cst_32 [1] : vector<8x256xf32> to vector<8xf32>
    %74 = vector.shape_cast %73 : vector<8xf32> to vector<8x1xf32>
    %c0_33 = arith.constant 0 : index
    %c0_34 = arith.constant 0 : index
    %75 = vector.load %arg5[%c0_33, %c0_34] : memref<8x1xf32, #tpu.memory_space<vmem>>, vector<8x1xf32>
    tpu.vector_store %arg5[%c0_33, %c0_34], %74 {strides = array<i32>} : memref<8x1xf32, #tpu.memory_space<vmem>>, vector<8x1xf32>,
    return
  }
  func.func @transform_0(%arg0: i32) -> (i32, i32) {
    %c0_i32 = arith.constant 0 : i32
    %c0_i32_0 = arith.constant 0 : i32
    return %arg0, %c0_i32 : i32, i32
  }
  func.func @transform_1(%arg0: i32) -> (i32, i32) {
    %c0_i32 = arith.constant 0 : i32
    %c0_i32_0 = arith.constant 0 : i32
    return %arg0, %c0_i32 : i32, i32
  }
  func.func @transform_2(%arg0: i32) -> (i32, i32) {
    %c0_i32 = arith.constant 0 : i32
    %c0_i32_0 = arith.constant 0 : i32
    %c0_i32_1 = arith.constant 0 : i32
    return %c0_i32, %c0_i32_0 : i32, i32
  }
  func.func @transform_3(%arg0: i32) -> (i32, i32) {
    %c0_i32 = arith.constant 0 : i32
    %c0_i32_0 = arith.constant 0 : i32
    return %arg0, %c0_i32 : i32, i32
  }
  func.func @transform_4(%arg0: i32) -> (i32, i32) {
    %c0_i32 = arith.constant 0 : i32
    %c0_i32_0 = arith.constant 0 : i32
    return %arg0, %c0_i32 : i32, i32
  }
}

</mosaic_0001>

<bundles_post_ra>
// kernel: tpu_custom_call.1
= control target key start
LH: loop header
LB: loop body
LE: loop exit
PB: predicated region body
PF: predicated region fallthrough
CT: control target
= control target key end

     0   :  { %10 = vsyncpa [#allocation4], 0  ;;  %s628_s0 = inlined_call_operand.hbm [shape: f32[8,256], index: 0, kind: input, shape index: {}]   ;;  %s629_s1 = inlined_call_operand.hbm [shape: f32[8,9], index: 1, kind: input, shape index: {}]   ;;  %s630_s2 = inlined_call_operand.hbm [shape: f32[3,256], index: 2, kind: input, shape index: {}]   ;;  %s631_s3 = inlined_call_operand.vmem [shape: f32[8,1], index: 3, kind: output, shape index: {0}]   ;;  %s632_s4 = inlined_call_operand.vmem [shape: f32[8,1], index: 4, kind: output, shape index: {1}]  }
   0x1   :  { %11 = vsyncpa [#allocation6], 0  ;;  %s506_s15 = smov [#allocation5]   ;;  %s507_s17 = smov [#allocation3]  }
   0x2   :  { %s28_s16 = sshll.u32 %s506_s15, 4  ;;  %s18_s18 = sshll.u32 %s507_s17, 4  ;;  %s29_s16 = int_to_ptr.vmem [resolvable:$true] %s28_s16  ;;  %s19_s18 = int_to_ptr.vmem [resolvable:$true] %s18_s18 }
   0x3   :  { %s450_s19 = scalar_lea.vmem %s29_s16, 128  ;;  %p455_p1 = scmp.lt.s32.totalorder %s29_s16, %s29_s16 }
   0x4   :  { %p451_p0 = scmp.ne.s32.totalorder %s29_s16, %s450_s19  ;;  %p456_p2 = scmp.lt.s32.totalorder %s450_s19, %s450_s19 }
   0x6   :  { %p457_p3 = por %p456_p2, %p455_p1 }
   0x8   :  { %p458_p4 = pnand %p457_p3, %p451_p0 }
   0xa   :  { %461 = shalt.err (!%p458_p4)
}
   0xb   :  { %31 = dma.hbm_to_vmem [thread:$0]  %s629_s1, 128, %s29_s16, [#allocation6]  }
   0xc   :  { %s470_s22 = scalar_lea.vmem %s19_s18, 256  ;;  %p475_p6 = scmp.lt.s32.totalorder %s19_s18, %s19_s18 }
   0xd   :  { %p471_p5 = scmp.ne.s32.totalorder %s19_s18, %s470_s22  ;;  %p476_p7 = scmp.lt.s32.totalorder %s470_s22, %s470_s22 }
   0xf   :  { %p477_p8 = por %p476_p7, %p475_p6 }
  0x11   :  { %p478_p9 = pnand %p477_p8, %p471_p5 }
  0x13   :  { %481 = shalt.err (!%p478_p9)
}
  0x14   :  { %21 = dma.hbm_to_vmem [thread:$0]  %s628_s0, 256, %s19_s18, [#allocation4]  }
  0x15   :  { %s508_s25 = smov [#allocation7]  }
  0x16   :  { %s38_s26 = sshll.u32 %s508_s25, 4  ;;  %s39_s26 = int_to_ptr.vmem [resolvable:$true] %s38_s26 }
  0x17   :  { %s490_s27 = scalar_lea.vmem %s39_s26, 128  ;;  %p495_p11 = scmp.lt.s32.totalorder %s39_s26, %s39_s26 }
  0x18   :  { %p491_p10 = scmp.ne.s32.totalorder %s39_s26, %s490_s27  ;;  %p496_p12 = scmp.lt.s32.totalorder %s490_s27, %s490_s27 }
  0x1a   :  { %p497_p13 = por %p496_p12, %p495_p11 }
  0x1c   :  { %p498_p0 = pnand %p497_p13, %p491_p10 }
  0x1e   :  { %501 = shalt.err (!%p498_p0)
}
  0x1f   :  { %41 = dma.hbm_to_vmem [thread:$0]  %s630_s2, 128, %s39_s26, [#allocation6]  }
  0x20   :  { %502 = dma.done.wait [#allocation4], 256  }
  0x21   :  { %503 = vsyncadd [#allocation4], 4294967040 }
  0x22   :  { %504 = dma.done.wait [#allocation6], 256  }
  0x23   :  { %505 = vsyncadd [#allocation6], 4294967040  ;;  %v65_v0 = vlaneseq  ;;  %v509_v1 = vmov 3   ;;  %v510_v2 = vmov 1   ;;  %v85_v5 = vld [vmem:[#allocation5] sm:$0xff]  ;;  %s511_s0 = smov 113  }
  0x24   :  { %434 = vset.pattern.permute.xlu1 %v509_v1  ;;  %432 = vset.pattern.permute.xlu0 %v510_v2  ;;  %v123_v6 = vld [vmem:[#allocation7 + $0x2] ss:$4 sm:$0x3]  ;;  %v63_v9 = vld [vmem:[#allocation7] ss:$4 sm:$0x3] }
  0x25   :  { %v66_v3 = vshrl.u32 %v65_v0, 7  ;;  %182 = vperm.xlu1 %434, %v85_v5   ;;  %98 = vperm.xlu0 %432, %v85_v5   ;;  %v512_v10 = vmov 2   ;;  %v513_v13 = vmov 5   ;;  %s514_s2 = smov 127   ;;  %v515_v15 = vmov 4   ;;  %s516_s29 = smov 1  }
  0x26   :  { %v517_v16 = vmov 7   ;;  %v518_v17 = vmov 6   ;;  %s519_s30 = smov 15   ;;  %v520_v18 = vmov 8   ;;  %s521_s5 = smov 17   ;;  %v523_v19 = vmov 0  }
  0x27   :  { %v67_v4 = vsub.s32 0, %v66_v3  ;;  %v71_v8 = vsub.s32 1, %v66_v3  ;;  %s522_s6 = smov 111   ;;  %v570_v20 = vld [vmem:[#allocation3] sm:$0xff]  ;;  %v572_v23 = vld [vmem:[#allocation3 + $0x8] sm:$0xff]  ;;  %vm137_vm0 = vcmask 924672  }
  0x28   :  { %s524_s7 = smov 126   ;;  %vm113_vm1 = vcmask 1039360   ;;  %s525_s8 = smov 112   ;;  %vm229_vm2 = vcmask 7168   ;;  %vm266_vm3 = vcmask 121856   ;;  %vm328_vm4 = vcmask 138240  }
  0x29   :  { %v128_v7 = vrot.slane %v123_v6, %v67_v4  ;;  %433 = vset.pattern.permute.xlu0 %v512_v10  ;;  %v132_v11 = vrot.slane %v123_v6, %v71_v8  ;;  %v68_v12 = vrot.slane %v63_v9, %v67_v4  ;;  %436 = vset.pattern.permute.xlu1 %v513_v13  ;;  %s526_s9 = smov 110   ;;  %s527_s10 = smov 96   ;;  %vm77_vm5 = vcmask 908288  }
  0x2a   :  { %146 = vperm.xlu0 %433, %v85_v5   ;;  %v72_v14 = vrot.slane %v63_v9, %v71_v8  ;;  %s528_s11 = smov 95   ;;  %s529_s12 = smov 94   ;;  %vm161_vm6 = vcmask 1031168   ;;  %vm197_vm7 = vcmask 916480   ;;  %vm253_vm8 = vcmask 900096  }
  0x2b   :  { %133 = vrot.lane.b32.xlu1 %v128_v7, %s511_s0  ;;  %vm290_vm9 = vcmask 785408   ;;  %vm315_vm10 = vcmask 777216   ;;  %vm352_vm11 = vcmask 769024  }
  0x2e   :  { %170 = vrot.lane.b32.xlu0 %v68_v12, %s514_s2 }
  0x2f   :  { %135 = vrot.lane.b32.xlu1 %v132_v11, %s511_s0  ;;  %435 = vset.pattern.permute.xlu0 %v515_v15 }
  0x32   :  { %207 = vperm.xlu0 %435, %v85_v5  }
  0x33   :  { %172 = vrot.lane.b32.xlu1 %v72_v14, %s514_s2 }
  0x36   :  { %227 = vrot.lane.b32.xlu0 %v132_v11, %s516_s29 }
  0x37   :  { %238 = vperm.xlu1 %436, %v85_v5   ;;  %438 = vset.pattern.permute.xlu0 %v517_v16 }
  0x3a   :  { %262 = vrot.lane.b32.xlu0 %v68_v12, %s519_s30 }
  0x3b   :  { %225 = vrot.lane.b32.xlu1 %v128_v7, %s516_s29 }
  0x3c   :  { %437 = vset.pattern.permute.xlu1 %v518_v17 }
  0x3e   :  { %300 = vperm.xlu0 %438, %v85_v5  }
  0x3f   :  { %275 = vperm.xlu1 %437, %v85_v5  }
  0x42   :  { %326 = vrot.lane.b32.xlu0 %v132_v11, %s521_s5 }
  0x43   :  { %264 = vrot.lane.b32.xlu1 %v72_v14, %s519_s30  ;;  %441 = vset.pattern.permute.xlu0 %v520_v18 }
  0x44   :  { %439 = vset.pattern.permute.xlu1 %v520_v18 }
  0x46   :  { %73 = vrot.lane.b32.xlu0 %v68_v12, %s522_s6 }
  0x47   :  { %337 = vperm.xlu1 %439, %v85_v5  }
  0x4b   :  { %324 = vrot.lane.b32.xlu1 %v128_v7, %s521_s5 }
  0x4c   :  { %440 = vset.pattern.permute.xlu1 %v523_v19 }
  0x4f   :  { %88 = vperm.xlu1 %440, %v85_v5  }
  0x53   :  { %75 = vrot.lane.b32.xlu1 %v72_v14, %s522_s6 }
  0xa0   :  { %v183_v21 = vpop.permute.xlu1 %182  ;;  %v99_v22 = vpop.permute.xlu0 %98 }
  0xa1   :  { %v101_v24 = vmul.f32 0.0, %v99_v22  ;;  %v102_v25 = vmul.f32 %v99_v22, %v570_v20  ;;  %v103_v26 = vmul.f32 %v99_v22, %v572_v23 }
  0xa3   :  { %107 = vrot.lane.b32.xlu0 %v101_v24, %s514_s2  ;;  %109 = vrot.lane.b32.xlu1 %v102_v25, %s514_s2 }
  0xa4   :  { %v134_v27 = vpop.permute.xlu1 %133 }
  0xa5   :  { %v142_v28 = vmul.f32 0.0, %v134_v27  ;;  %v147_v29 = vpop.permute.xlu0 %146 }
  0xa7   :  { %v149_v30 = vmul.f32 %v147_v29, %v142_v28  ;;  %111 = vrot.lane.b32.xlu0 %v103_v26, %s514_s2 }
  0xa8   :  { %v136_v31 = vpop.permute.xlu1 %135 }
  0xa9   :  { %v138_v32 = vsel %vm137_vm0, %v134_v27, %v136_v31  ;;  %v144_v33 = vmul.f32 %v136_v31, %v572_v23  ;;  %v171_v34 = vpop.permute.xlu0 %170  ;;  %155 = vrot.lane.b32.xlu1 %v149_v30, %s524_s7 }
  0xaa   :  { %v143_v35 = vmul.f32 %v138_v32, %v570_v20  ;;  %v178_v37 = vmul.f32 0.0, %v171_v34 }
  0xab   :  { %v151_v36 = vmul.f32 %v147_v29, %v144_v33 }
  0xac   :  { %v173_v38 = vpop.permute.xlu1 %172  ;;  %v150_v39 = vmul.f32 %v147_v29, %v143_v35  ;;  %v185_v43 = vmul.f32 %v183_v21, %v178_v37 }
  0xad   :  { %v174_v40 = vsel %vm113_vm1, %v171_v34, %v173_v38  ;;  %159 = vrot.lane.b32.xlu1 %v151_v36, %s524_s7  ;;  %v208_v41 = vpop.permute.xlu0 %207  ;;  %v180_v44 = vmul.f32 %v173_v38, %v572_v23 }
  0xae   :  { %v179_v42 = vmul.f32 %v174_v40, %v570_v20  ;;  %157 = vrot.lane.b32.xlu0 %v150_v39, %s524_s7  ;;  %v210_v47 = vmul.f32 %v208_v41, %v570_v20  ;;  %v211_v55 = vmul.f32 %v208_v41, %v572_v23 }
  0xaf   :  { %v187_v49 = vmul.f32 %v183_v21, %v180_v44 }
  0xb0   :  { %v186_v46 = vmul.f32 %v183_v21, %v179_v42 }
  0xb1   :  { %v228_v48 = vpop.permute.xlu0 %227 }
  0xb2   :  { %v239_v45 = vpop.permute.xlu1 %238  ;;  %191 = vrot.lane.b32.xlu0 %v185_v43, %s525_s8  ;;  %193 = vrot.lane.b32.xlu1 %v186_v46, %s525_s8  ;;  %v236_v56 = vmul.f32 0.0, %v228_v48 }
  0xb4   :  { %v243_v59 = vmul.f32 %v239_v45, %v236_v56 }
  0xb5   :  { %v263_v53 = vpop.permute.xlu0 %262 }
  0xb6   :  { %v226_v50 = vpop.permute.xlu1 %225  ;;  %195 = vrot.lane.b32.xlu0 %v187_v49, %s525_s8  ;;  %214 = vrot.lane.b32.xlu1 %v210_v47, %s522_s6  ;;  %v271_v60 = vmul.f32 %v263_v53, %v570_v20 }
  0xb7   :  { %v230_v51 = vsel %vm229_vm2, %v226_v50, %v228_v48  ;;  %v234_v52 = vmul.f32 %v226_v50, %v570_v20 }
  0xb8   :  { %v235_v57 = vmul.f32 %v230_v51, %v572_v23 }
  0xb9   :  { %v241_v54 = vmul.f32 %v239_v45, %v234_v52  ;;  %v301_v63 = vpop.permute.xlu0 %300 }
  0xba   :  { %v276_v58 = vpop.permute.xlu1 %275  ;;  %216 = vrot.lane.b32.xlu0 %v211_v55, %s522_s6  ;;  %v242_v62 = vmul.f32 %v239_v45, %v235_v57  ;;  %v303_v6 = vmul.f32 %v301_v63, %v570_v20  ;;  %v304_v11 = vmul.f32 %v301_v63, %v572_v23  ;;  %v305_v12 = vmul.f32 0.0, %v301_v63 }
  0xbb   :  { %247 = vrot.lane.b32.xlu1 %v241_v54, %s526_s9  ;;  %v278_v2 = vmul.f32 %v276_v58, %v271_v60 }
  0xbd   :  { %v327_v7 = vpop.permute.xlu0 %326 }
  0xbe   :  { %v265_v61 = vpop.permute.xlu1 %264  ;;  %249 = vrot.lane.b32.xlu0 %v242_v62, %s526_s9  ;;  %v335_v15 = vmul.f32 0.0, %v327_v7 }
  0xbf   :  { %v267_v0 = vsel %vm266_vm3, %v263_v53, %v265_v61  ;;  %251 = vrot.lane.b32.xlu1 %v243_v59, %s526_s9  ;;  %v273_v3 = vmul.f32 0.0, %v265_v61 }
  0xc0   :  { %v272_v1 = vmul.f32 %v267_v0, %v572_v23 }
  0xc1   :  { %v280_v8 = vmul.f32 %v276_v58, %v273_v3  ;;  %v74_v21 = vpop.permute.xlu0 %73 }
  0xc2   :  { %v338_v4 = vpop.permute.xlu1 %337  ;;  %v279_v5 = vmul.f32 %v276_v58, %v272_v1  ;;  %284 = vrot.lane.b32.xlu0 %v278_v2, %s527_s10  ;;  %v82_v34 = vmul.f32 0.0, %v74_v21 }
  0xc3   :  { %v342_v18 = vmul.f32 %v338_v4, %v335_v15 }
  0xc4   :  { %286 = vrot.lane.b32.xlu1 %v279_v5, %s527_s10 }
  0xc6   :  { %v325_v9 = vpop.permute.xlu1 %324  ;;  %288 = vrot.lane.b32.xlu0 %v280_v8, %s527_s10 }
  0xc7   :  { %v329_v10 = vsel %vm328_vm4, %v325_v9, %v327_v7  ;;  %v333_v13 = vmul.f32 %v325_v9, %v570_v20 }
  0xc8   :  { %309 = vrot.lane.b32.xlu1 %v303_v6, %s528_s11  ;;  %v334_v14 = vmul.f32 %v329_v10, %v572_v23 }
  0xc9   :  { %v340_v16 = vmul.f32 %v338_v4, %v333_v13 }
  0xca   :  { %311 = vrot.lane.b32.xlu0 %v304_v11, %s528_s11  ;;  %v341_v17 = vmul.f32 %v338_v4, %v334_v14  ;;  %v89_v19 = vpop.permute.xlu1 %88 }
  0xcb   :  { %v91_v39 = vmul.f32 %v89_v19, %v82_v34 }
  0xcc   :  { %313 = vrot.lane.b32.xlu1 %v305_v12, %s528_s11 }
  0xce   :  { %346 = vrot.lane.b32.xlu0 %v340_v16, %s529_s12  ;;  %v76_v22 = vpop.permute.xlu1 %75 }
  0xcf   :  { %v78_v35 = vsel %vm77_vm5, %v74_v21, %v76_v22  ;;  %v84_v45 = vmul.f32 %v76_v22, %v572_v23 }
  0xd0   :  { %348 = vrot.lane.b32.xlu1 %v341_v17, %s529_s12  ;;  %v83_v38 = vmul.f32 %v78_v35, %v570_v20 }
  0xd1   :  { %v93_v54 = vmul.f32 %v89_v19, %v84_v45 }
  0xd2   :  { %350 = vrot.lane.b32.xlu0 %v342_v18, %s529_s12  ;;  %v92_v47 = vmul.f32 %v89_v19, %v83_v38 }
 0x115   :  { %v108_v24 = vpop.permute.xlu0 %107  ;;  %v110_v25 = vpop.permute.xlu1 %109 }
 0x116   :  { %v114_v40 = vsel %vm113_vm1, %v108_v24, %v110_v25 }
 0x117   :  { %v119_v46 = vadd.f32 %v114_v40, %v91_v39 }
 0x119   :  { %v112_v27 = vpop.permute.xlu0 %111 }
 0x11a   :  { %v115_v43 = vsel %vm113_vm1, %v110_v25, %v112_v27  ;;  %v121_v58 = vadd.f32 %v112_v27, %v93_v54 }
 0x11b   :  { %v156_v26 = vpop.permute.xlu1 %155  ;;  %v120_v50 = vadd.f32 %v115_v43, %v92_v47 }
 0x11f   :  { %v160_v28 = vpop.permute.xlu1 %159 }
 0x120   :  { %v158_v29 = vpop.permute.xlu0 %157  ;;  %v169_v62 = vadd.f32 %v160_v28, %v121_v58 }
 0x121   :  { %v162_v44 = vsel %vm161_vm6, %v156_v26, %v158_v29  ;;  %v163_v48 = vsel %vm161_vm6, %v158_v29, %v160_v28 }
 0x122   :  { %v167_v51 = vadd.f32 %v162_v44, %v119_v46  ;;  %v168_v55 = vadd.f32 %v163_v48, %v120_v50 }
 0x124   :  { %v192_v30 = vpop.permute.xlu0 %191  ;;  %v194_v31 = vpop.permute.xlu1 %193 }
 0x125   :  { %v198_v49 = vsel %vm197_vm7, %v192_v30, %v194_v31 }
 0x126   :  { %v203_v56 = vadd.f32 %v198_v49, %v167_v51 }
 0x128   :  { %v196_v32 = vpop.permute.xlu0 %195  ;;  %v215_v33 = vpop.permute.xlu1 %214 }
 0x129   :  { %v199_v53 = vsel %vm197_vm7, %v194_v31, %v196_v32  ;;  %v222_v63 = vadd.f32 %v215_v33, %v203_v56  ;;  %v205_v2 = vadd.f32 %v196_v32, %v169_v62 }
 0x12a   :  { %v204_v59 = vadd.f32 %v199_v53, %v168_v55 }
 0x12c   :  { %v217_v36 = vpop.permute.xlu0 %216 }
 0x12d   :  { %v248_v37 = vpop.permute.xlu1 %247  ;;  %v218_v57 = vsel %vm77_vm5, %v215_v33, %v217_v36  ;;  %v224_v9 = vadd.f32 %v217_v36, %v205_v2 }
 0x12e   :  { %v223_v0 = vadd.f32 %v218_v57, %v204_v59  ;;  %v259_v3 = vadd.f32 %v248_v37, %v222_v63 }
 0x130   :  { %v250_v41 = vpop.permute.xlu0 %249 }
 0x131   :  { %v252_v42 = vpop.permute.xlu1 %251  ;;  %v254_v61 = vsel %vm253_vm8, %v248_v37, %v250_v41 }
 0x132   :  { %v260_v4 = vadd.f32 %v254_v61, %v223_v0  ;;  %v255_v7 = vsel %vm253_vm8, %v250_v41, %v252_v42 }
 0x133   :  { %v261_v13 = vadd.f32 %v255_v7, %v224_v9 }
 0x134   :  { %v285_v52 = vpop.permute.xlu0 %284 }
 0x135   :  { %v296_v10 = vadd.f32 %v285_v52, %v259_v3 }
 0x136   :  { %v287_v20 = vpop.permute.xlu1 %286 }
 0x137   :  { %v291_v1 = vsel %vm290_vm9, %v285_v52, %v287_v20 }
 0x138   :  { %v289_v60 = vpop.permute.xlu0 %288  ;;  %v297_v11 = vadd.f32 %v291_v1, %v260_v4 }
 0x139   :  { %v292_v12 = vsel %vm290_vm9, %v287_v20, %v289_v60 }
 0x13a   :  { %v310_v23 = vpop.permute.xlu1 %309  ;;  %v298_v21 = vadd.f32 %v292_v12, %v261_v13 }
 0x13b   :  { %v321_v14 = vadd.f32 %v310_v23, %v296_v10 }
 0x13c   :  { %v312_v5 = vpop.permute.xlu0 %311 }
 0x13d   :  { %v316_v8 = vsel %vm315_vm10, %v310_v23, %v312_v5 }
 0x13e   :  { %v314_v6 = vpop.permute.xlu1 %313  ;;  %v322_v15 = vadd.f32 %v316_v8, %v297_v11 }
 0x13f   :  { %v317_v18 = vsel %vm315_vm10, %v312_v5, %v314_v6 }
 0x140   :  { %v347_v16 = vpop.permute.xlu0 %346  ;;  %v323_v25 = vadd.f32 %v317_v18, %v298_v21 }
 0x141   :  { %v358_v22 = vadd.f32 %v347_v16, %v321_v14 }
 0x142   :  { %v349_v17 = vpop.permute.xlu1 %348 }
 0x143   :  { %v353_v19 = vsel %vm352_vm11, %v347_v16, %v349_v17  ;;  %v378_v28 = vmul.f32 %v358_v22, %v358_v22 }
 0x144   :  { %v359_v24 = vadd.f32 %v353_v19, %v322_v15  ;;  %v351_v26 = vpop.permute.xlu0 %350 }
 0x145   :  { %v354_v27 = vsel %vm352_vm11, %v349_v17, %v351_v26 }
 0x146   :  { %366 = vrot.lane.b32.xlu0 %v359_v24, %s521_s5  ;;  %v360_v29 = vadd.f32 %v354_v27, %v323_v25  ;;  %v379_v31 = vmul.f32 %v359_v24, %v359_v24 }
 0x148   :  { %368 = vrot.lane.b32.xlu1 %v360_v29, %s521_s5  ;;  %v380_v30 = vmul.f32 %v360_v29, %v360_v29 }
 0x14a   :  { %384 = vrot.lane.b32.xlu0 %v378_v28, %s521_s5 }
 0x14c   :  { %364 = vrot.lane.b32.xlu1 %v358_v22, %s521_s5 }
 0x14e   :  { %388 = vrot.lane.b32.xlu0 %v380_v30, %s521_s5 }
 0x150   :  { %386 = vrot.lane.b32.xlu1 %v379_v31, %s521_s5 }
 0x1b8   :  { %v367_v32 = vpop.permute.xlu0 %366 }
 0x1ba   :  { %v369_v33 = vpop.permute.xlu1 %368 }
 0x1bb   :  { %v371_v36 = vsel %vm328_vm4, %v367_v32, %v369_v33 }
 0x1bc   :  { %v385_v34 = vpop.permute.xlu0 %384 }
 0x1be   :  { %v365_v35 = vpop.permute.xlu1 %364 }
 0x1bf   :  { %v370_v37 = vsel %vm328_vm4, %v365_v35, %v367_v32 }
 0x1c0   :  { %v374_v38 = vadd.f32 %v371_v36, %v370_v37  ;;  %v389_v39 = vpop.permute.xlu0 %388 }
 0x1c2   :  { %375 = vadd.xlane.f32.xlu1 %v374_v38  ;;  %v387_v40 = vpop.permute.xlu1 %386 }
 0x1c3   :  { %v390_v41 = vsel %vm328_vm4, %v385_v34, %v387_v40  ;;  %v391_v42 = vsel %vm328_vm4, %v387_v40, %v389_v39 }
 0x1c4   :  { %v394_v43 = vadd.f32 %v391_v42, %v390_v41 }
 0x1c6   :  { %395 = vadd.xlane.f32.xlu0 %v394_v43 }
 0x24b   :  { %v376_v44 = vpop.xlane.xlu1 %375 }
 0x24c   :  { %377 = vst.msk [vmem:[%s631_s3] sm:$0xff] %vm229_vm2, %v376_v44 }
 0x24f   :  { %v396_v45 = vpop.xlane.xlu0 %395 }
 0x250   :  { %397 = vst.msk [vmem:[%s632_s4] sm:$0xff] %vm229_vm2, %v396_v45 }
 0x251   :  { %406 = vsyncpa [#allocation4], 1 }
 0x252   :  { %407 = vsyncpa [#allocation6], 1 }

</bundles_post_ra>
